<compile_context>
chip_gen: v7x
topology: tpu7x:2x2x1
jax: 0.10.0
libtpu: 0.0.40
codegen_flags: <defaults>
</compile_context>

<pallas_src>
import functools
import math

import jax
import jax.numpy as jnp
import numpy as np
from jax import lax
from jax.experimental import pallas as pl
from jax.experimental.pallas import tpu as pltpu


def _cdiv(a, b):
    return -(-a // b)


def _patch_copy_kernel(x_ref, o_ref, *, bp, rb, npw, ph, pw, unrolled):
    """x_ref: (bp, C, rb*ph, W)  ->  o_ref: (bp, rb*npw, C, ph, pw)."""
    if unrolled:
        # Small patch count: fully static slice copies (pure vld/vst).
        for bi in range(bp):
            for r in range(rb):
                for j in range(npw):
                    o_ref[bi, r * npw + j] = x_ref[
                        bi, :, r * ph:(r + 1) * ph, j * pw:(j + 1) * pw]
    else:
        # Large patch count: loop over (image, patch-row) to avoid Mosaic code
        # bloat / long compiles.  Dynamic offsets only touch non-lane axes
        # (batch index, output patch index, input sublane offset); the lane (W)
        # slices stay static.  Runtime-neutral: the kernel is HBM-DMA bound.
        inner_unroll = max(1, min(8, 64 // max(1, npw)))

        def body(idx, carry):
            bi = idx // rb
            r = idx - bi * rb
            row0 = pl.multiple_of(r * ph, ph)
            for j in range(npw):
                o_ref[bi, r * npw + j] = x_ref[
                    bi, :, pl.ds(row0, ph), j * pw:(j + 1) * pw]
            return carry

        lax.fori_loop(0, bp * rb, body, 0, unroll=inner_unroll)


def patch_extractor(x, patch_height: int, patch_width: int):
    """Pallas equivalent of PatchExtractor.forward (NCHW in)."""
    b, c, h, w = x.shape
    ph, pw = int(patch_height), int(patch_width)
    assert h % ph == 0 and w % pw == 0, (
        "Tensor dimensions must be divisible by patch size.")
    nph, npw = h // ph, w // pw
    num_patches = nph * npw

    itemsize = np.dtype(x.dtype).itemsize
    min_sublane = {4: 8, 2: 16, 1: 32}.get(itemsize, 8)
    # Smallest patch-row multiple whose height (rb*ph) is sublane-aligned.
    row_align = min_sublane // math.gcd(ph, min_sublane)

    # ---- chip-aware VMEM budget ---------------------------------------------
    try:
        vmem_cap = int(getattr(pltpu.get_tpu_info(), "vmem_capacity_bytes",
                               64 * 2**20))
    except Exception:  # conservative fallback if the query is unavailable
        vmem_cap = 64 * 2**20
    # ~24 MiB of blocks on v7x (64 MiB/TC), ~56 MiB on v5e/v6e (128 MiB).
    budget_bytes = max(16 * 2**20, vmem_cap // 2 - 8 * 2**20)

    # One patch-row of one image.  Input and output blocks are the same size
    # because the input block spans the full width (npw * pw == w).
    per_row_bytes = c * ph * w * itemsize

    # ---- rows per block (no nph-divisibility requirement) --------------------
    max_rows = max(1, budget_bytes // (4 * per_row_bytes))   # 2 in + 2 out bufs
    if max_rows >= nph:
        rb = nph                              # whole image height per step
    else:
        rb = (max_rows // row_align) * row_align
        rb = max(rb, row_align)               # may overshoot budget; see vmem_limit
        rb = min(rb, nph)                     # == nph -> full-extent escape, legal
    # TODO(synk): when even a single aligned patch-row block exceeds the budget
    # (huge C*ph*W), split along W with a third grid axis instead of only
    # raising vmem_limit_bytes.

    # ---- images per block (amortize per-step overhead for small images) ------
    bp = max(1, min(b, budget_bytes // (4 * rb * per_row_bytes)))

    # ---- keep >= 2 grid steps where possible so both v7x TCs get work --------
    n_bb, n_rb = _cdiv(b, bp), _cdiv(nph, rb)
    if n_bb * n_rb < 2:
        if bp > 1:
            bp = (bp + 1) // 2
        elif rb > 1:
            half = _cdiv(_cdiv(rb, 2), row_align) * row_align
            if half < nph:
                rb = half
        n_bb, n_rb = _cdiv(b, bp), _cdiv(nph, rb)

    block_bytes = bp * rb * per_row_bytes

    # Deep-buffer tiny blocks on long grids: per-step compute is ~zero, so extra
    # pipeline depth hides DMA issue latency for one extra block of VMEM.
    deep_buffer = (block_bytes <= 2 * 2**20 and n_bb * n_rb >= 4
                   and hasattr(pl, "Buffered"))
    in_bufs = 3 if deep_buffer else 2
    working_set = (in_bufs + 2) * block_bytes
    vmem_limit = max(32 * 2**20, working_set + 4 * 2**20)
    vmem_limit = int(min(vmem_limit, vmem_cap - 2 * 2**20))

    in_block = (bp, c, rb * ph, w)
    in_map = lambda bi, ri: (bi, 0, ri, 0)
    out_block = (bp, rb * npw, c, ph, pw)
    out_map = lambda bi, ri: (bi, ri, 0, 0, 0)

    if deep_buffer:
        try:
            in_spec = pl.BlockSpec(in_block, in_map,
                                   pipeline_mode=pl.Buffered(3))
        except TypeError:
            in_spec = pl.BlockSpec(in_block, in_map)
    else:
        in_spec = pl.BlockSpec(in_block, in_map)
    out_spec = pl.BlockSpec(out_block, out_map)

    copies = bp * rb * npw
    kernel = functools.partial(
        _patch_copy_kernel, bp=bp, rb=rb, npw=npw, ph=ph, pw=pw,
        unrolled=(copies <= 128))

    # TODO(synk): the largest possible win is outside this file — fuse the
    # patchify into the downstream patch-embedding matmul's LHS index_map and
    # skip this HBM round trip entirely.
    return pl.pallas_call(
        kernel,
        out_shape=jax.ShapeDtypeStruct((b, num_patches, c, ph, pw), x.dtype),
        grid_spec=pltpu.PrefetchScalarGridSpec(
            num_scalar_prefetch=0,
            grid=(n_bb, n_rb),
            in_specs=[in_spec],
            out_specs=out_spec,
        ),
        compiler_params=pltpu.CompilerParams(
            # Every grid step writes a disjoint output slab: both axes are pure
            # independent copies (shards across v7x's two TensorCores; no-op on
            # single-TC v5e/v6e).
            dimension_semantics=("parallel", "parallel"),
            vmem_limit_bytes=vmem_limit,
        ),
    )(x)


def _reference(x, ph, pw):
    # Pure-JAX reference reproducing torch unfold/permute/reshape semantics.
    b, c, h, w = x.shape
    nph, npw = h // ph, w // pw
    p = x.reshape(b, c, nph, ph, npw, pw)
    p = jnp.transpose(p, (0, 2, 4, 1, 3, 5))   # (B, nph, npw, C, ph, pw)
    return p.reshape(b, nph * npw, c, ph, pw)


if __name__ == "__main__":
    # PatchExtractor has no learnable parameters; only inputs are needed.
    key = jax.random.PRNGKey(0)
    B, C, H, W = 2, 4, 16, 16
    PH, PW = 8, 8   # ViT-style (non-128-aligned) patch size now supported
    x = jax.random.normal(key, (B, C, H, W), dtype=jnp.float32)

    out = jax.block_until_ready(patch_extractor(x, PH, PW))

    expected_shape = (B, (H // PH) * (W // PW), C, PH, PW)
    assert out.shape == expected_shape, (out.shape, expected_shape)

    ref = _reference(x, PH, PW)
    np.testing.assert_array_equal(np.asarray(out), np.asarray(ref))

    print("KERNEL_OK")
</pallas_src>

<mosaic_0001>
module attributes {stable_mosaic.version = 11 : i64} {
  func.func @_patch_copy_kernel(%arg0: i32, %arg1: i32, %arg2: memref<1x4x16x16xf32, #tpu.memory_space<vmem>>, %arg3: memref<1x4x4x8x8xf32, #tpu.memory_space<vmem>>) attributes {dimension_semantics = [#tpu.dimension_semantics<parallel>, #tpu.dimension_semantics<parallel>], iteration_bounds = array<i64: 2, 1>, scalar_prefetch = 0 : i64, scratch_operands = 0 : i64, tpu.core_type = #tpu.core_type<tc>, window_params = [{transform_indices = @transform_0, window_bounds = array<i64: 1, 4, 16, 16>}, {transform_indices = @transform_1, window_bounds = array<i64: 1, 4, 4, 8, 8>}]} {
    %c0 = arith.constant 0 : index
    %c0_0 = arith.constant 0 : index
    %c0_1 = arith.constant 0 : index
    %c0_2 = arith.constant 0 : index
    %0 = vector.load %arg2[%c0, %c0_0, %c0_1, %c0_2] : memref<1x4x16x16xf32, #tpu.memory_space<vmem>>, vector<1x4x8x8xf32>
    %1 = vector.shape_cast %0 : vector<1x4x8x8xf32> to vector<4x8x8xf32>
    %c0_3 = arith.constant 0 : index
    %c0_4 = arith.constant 0 : index
    %c0_5 = arith.constant 0 : index
    %c0_6 = arith.constant 0 : index
    %c0_7 = arith.constant 0 : index
    %2 = vector.load %arg3[%c0_3, %c0_4, %c0_5, %c0_6, %c0_7] : memref<1x4x4x8x8xf32, #tpu.memory_space<vmem>>, vector<1x1x4x8x8xf32>
    %3 = vector.shape_cast %2 : vector<1x1x4x8x8xf32> to vector<4x8x8xf32>
    %4 = vector.shape_cast %1 : vector<4x8x8xf32> to vector<1x1x4x8x8xf32>
    tpu.vector_store %arg3[%c0_3, %c0_4, %c0_5, %c0_6, %c0_7], %4 {strides = array<i32>} : memref<1x4x4x8x8xf32, #tpu.memory_space<vmem>>, vector<1x1x4x8x8xf32>,
    %c0_8 = arith.constant 0 : index
    %c0_9 = arith.constant 0 : index
    %c0_10 = arith.constant 0 : index
    %c8 = arith.constant 8 : index
    %5 = vector.load %arg2[%c0_8, %c0_9, %c0_10, %c8] : memref<1x4x16x16xf32, #tpu.memory_space<vmem>>, vector<1x4x8x8xf32>
    %6 = vector.shape_cast %5 : vector<1x4x8x8xf32> to vector<4x8x8xf32>
    %c0_11 = arith.constant 0 : index
    %c1 = arith.constant 1 : index
    %c0_12 = arith.constant 0 : index
    %c0_13 = arith.constant 0 : index
    %c0_14 = arith.constant 0 : index
    %7 = vector.load %arg3[%c0_11, %c1, %c0_12, %c0_13, %c0_14] : memref<1x4x4x8x8xf32, #tpu.memory_space<vmem>>, vector<1x1x4x8x8xf32>
    %8 = vector.shape_cast %7 : vector<1x1x4x8x8xf32> to vector<4x8x8xf32>
    %9 = vector.shape_cast %6 : vector<4x8x8xf32> to vector<1x1x4x8x8xf32>
    tpu.vector_store %arg3[%c0_11, %c1, %c0_12, %c0_13, %c0_14], %9 {strides = array<i32>} : memref<1x4x4x8x8xf32, #tpu.memory_space<vmem>>, vector<1x1x4x8x8xf32>,
    %c0_15 = arith.constant 0 : index
    %c0_16 = arith.constant 0 : index
    %c8_17 = arith.constant 8 : index
    %c0_18 = arith.constant 0 : index
    %10 = vector.load %arg2[%c0_15, %c0_16, %c8_17, %c0_18] : memref<1x4x16x16xf32, #tpu.memory_space<vmem>>, vector<1x4x8x8xf32>
    %11 = vector.shape_cast %10 : vector<1x4x8x8xf32> to vector<4x8x8xf32>
    %c0_19 = arith.constant 0 : index
    %c2 = arith.constant 2 : index
    %c0_20 = arith.constant 0 : index
    %c0_21 = arith.constant 0 : index
    %c0_22 = arith.constant 0 : index
    %12 = vector.load %arg3[%c0_19, %c2, %c0_20, %c0_21, %c0_22] : memref<1x4x4x8x8xf32, #tpu.memory_space<vmem>>, vector<1x1x4x8x8xf32>
    %13 = vector.shape_cast %12 : vector<1x1x4x8x8xf32> to vector<4x8x8xf32>
    %14 = vector.shape_cast %11 : vector<4x8x8xf32> to vector<1x1x4x8x8xf32>
    tpu.vector_store %arg3[%c0_19, %c2, %c0_20, %c0_21, %c0_22], %14 {strides = array<i32>} : memref<1x4x4x8x8xf32, #tpu.memory_space<vmem>>, vector<1x1x4x8x8xf32>,
    %c0_23 = arith.constant 0 : index
    %c0_24 = arith.constant 0 : index
    %c8_25 = arith.constant 8 : index
    %c8_26 = arith.constant 8 : index
    %15 = vector.load %arg2[%c0_23, %c0_24, %c8_25, %c8_26] : memref<1x4x16x16xf32, #tpu.memory_space<vmem>>, vector<1x4x8x8xf32>
    %16 = vector.shape_cast %15 : vector<1x4x8x8xf32> to vector<4x8x8xf32>
    %c0_27 = arith.constant 0 : index
    %c3 = arith.constant 3 : index
    %c0_28 = arith.constant 0 : index
    %c0_29 = arith.constant 0 : index
    %c0_30 = arith.constant 0 : index
    %17 = vector.load %arg3[%c0_27, %c3, %c0_28, %c0_29, %c0_30] : memref<1x4x4x8x8xf32, #tpu.memory_space<vmem>>, vector<1x1x4x8x8xf32>
    %18 = vector.shape_cast %17 : vector<1x1x4x8x8xf32> to vector<4x8x8xf32>
    %19 = vector.shape_cast %16 : vector<4x8x8xf32> to vector<1x1x4x8x8xf32>
    tpu.vector_store %arg3[%c0_27, %c3, %c0_28, %c0_29, %c0_30], %19 {strides = array<i32>} : memref<1x4x4x8x8xf32, #tpu.memory_space<vmem>>, vector<1x1x4x8x8xf32>,
    return
  }
  func.func @transform_0(%arg0: i32, %arg1: i32) -> (i32, i32, i32, i32) {
    %c0_i32 = arith.constant 0 : i32
    %c0_i32_0 = arith.constant 0 : i32
    %c0_i32_1 = arith.constant 0 : i32
    return %arg0, %c0_i32, %arg1, %c0_i32_0 : i32, i32, i32, i32
  }
  func.func @transform_1(%arg0: i32, %arg1: i32) -> (i32, i32, i32, i32, i32) {
    %c0_i32 = arith.constant 0 : i32
    %c0_i32_0 = arith.constant 0 : i32
    %c0_i32_1 = arith.constant 0 : i32
    %c0_i32_2 = arith.constant 0 : i32
    return %arg0, %arg1, %c0_i32, %c0_i32_0, %c0_i32_1 : i32, i32, i32, i32, i32
  }
}

</mosaic_0001>

<bundles_post_ra>
// kernel: tpu_custom_call.1
= control target key start
LH: loop header
LB: loop body
LE: loop exit
PB: predicated region body
PF: predicated region fallthrough
CT: control target
= control target key end

     0   :  { %6 = vsyncpa [#allocation3], 0  ;;  %s765_s0 = inlined_call_operand.hbm [shape: f32[2,4,16,16], index: 0, kind: input, shape index: {}]   ;;  %s766_s1 = inlined_call_operand.hbm [shape: f32[2,4,4,8,8], index: 1, kind: output, shape index: {}]  }
   0x1   :  { %8 = vsyncpa [#allocation3 + $0x1], 0 }
   0x2   :  { %9 = vsyncpa [#allocation4], 0 }
   0x3   :  { %11 = vsyncpa [#allocation4 + $0x1], 0  ;;  %s554_s6 = smov 0   ;;  %s556_s7 = smov 0  }
   0x4   :  { %s558_s8 = smov 0   ;;  %s560_s9 = smov 0  }
   0x5   :  { %s562_s10 = smov 0   ;;  %s564_s11 = smov 0  }
   0x6 LB: > { %s327_s12 = sadd.s32 4294967295, %s535_s11   ;;  %s328_s13 = sadd.s32 4294967294, %s535_s11   ;;  %s535_s11 = sphi %s564_s11, %s17_s11   ;;  %s531_s10 = sphi %s562_s10, %s781_s10   ;;  %s527_s9 = sphi %s560_s9, %s780_s9   ;;  %s523_s8 = sphi %s558_s8, %s779_s8   ;;  %s519_s7 = sphi %s556_s7, %s778_s7   ;;  %s515_s6 = sphi %s554_s6, %s777_s6  }
   0x7   : > { %s29_s14 = sadd.s32 1, %s531_s10  ;;  %s38_s15 = sadd.s32 1, %s523_s8 }
   0x8   : > { %p31_p0 = scmp.ge.s32.totalorder %s29_s14, 2  ;;  %p45_p1 = scmp.ne.s32.totalorder %s523_s8, %s519_s7 }
   0x9   : > { %p46_p2 = scmp.eq.s32.totalorder %s535_s11, 0  ;;  %p51_p3 = scmp.ne.s32.totalorder %s519_s7, %s515_s6 }
   0xa   : > { %s783_s14 = smov (%p31_p0, %s29_s14), 0  ;;  %p52_p5 = scmp.eq.s32.totalorder %s327_s12, 0 }
   0xb   : > { %p595_p4 = por %p46_p2, %p45_p1  ;;  %s33_s17 = ssub.s32 %s531_s10, %s783_s14 }
   0xc   : > { %p77_p6 = scmp.eq.s32.totalorder %s327_s12, 1  ;;  %p36_p7 = scmp.eq.s32.totalorder %s33_s17, 0 }
   0xd   : > { %p601_p8 = por %p52_p5, %p51_p3  ;;  %p83_p10 = scmp.eq.s32.totalorder %s328_s13, 1 }
   0xe   : > { %p605_p9 = por %p77_p6, %p45_p1  ;;  %p368_p13 = scmp.lt.s32.totalorder %s535_s11, 2 }
   0xf   : > { %s610_s20 = scalar_select %p36_p7, %s523_s8, %s38_s15  }
  0x10   : > { %s770_s19 = scalar_select %p605_p9, 1, 0 }
  0x11   : > { %p612_p11 = por %p83_p10, %p51_p3  ;;  %s103_s22 = sand.u32 1, %s523_s8  }
  0x12   : > { %s331_s23 = sshll.u32 %s103_s22, 6  ;;  %s354_s24 = sshll.u32 %s531_s10, 10 }
  0x13   : > { %s771_s21 = scalar_select %p612_p11, 1, 0 }
  0x14   : > { %s623_s27 = scalar_lea.hbm %s765_s0, %s354_s24  ;;  %s107_s28 = scalar_lea.vmem [#allocation2], %s331_s23 }
  0x15   : > { %s116_s29 = sshll.u32 %s107_s28, 4  ;;  %p629_p0 = pnand %p368_p13, %p595_p4  ;;  %s625_s29 = int_to_ptr.vmem [resolvable:$true] %s116_s29 }
  0x16   : > { %s634_s2 = scalar_lea.sflag [#allocation3], %s103_s22  ;;  %s423_s3 = scalar_lea.hbm %s623_s27, 1024 }
  0x17   : > { %p424_p2 = scmp.ne.s32.totalorder %s623_s27, %s423_s3  ;;  %p425_p3 = pneg %p629_p0 }
  0x18   : > { %s428_s12 = scalar_lea.hbm %s765_s0, 2048  ;;  %p429_p4 = scmp.lt.u32.totalorder %s623_s27, %s765_s0 }
  0x19   : > { %p426_p5 = pnand %p425_p3, %p424_p2  ;;  %p430_p7 = scmp.lt.u32.totalorder %s428_s12, %s423_s3 }
  0x1a   : > { %p432_p13 = scmp.lt.u32.totalorder %s423_s3, %s623_s27 }
  0x1b   : > { %p427_p6 = pneg %p426_p5  ;;  %p431_p10 = por %p430_p7, %p429_p4 }
  0x1d   : > { %p433_p12 = por %p432_p13, %p431_p10 }
  0x1f   : > { %p434_p1 = pnand %p433_p12, %p427_p6 }
  0x21   : > { %437 = shalt.err (!%p434_p1)
}
  0x22   : > { %s438_s16 = scalar_lea.vmem %s625_s29, 1024  ;;  %s537_s17 = smov [#allocation2]  }
  0x23   : > { %p439_p2 = scmp.ne.s32.totalorder %s625_s29, %s438_s16  ;;  %s443_s22 = sshll.u32 %s537_s17, 4  ;;  %s444_s22 = int_to_ptr.vmem [resolvable:$false] %s443_s22 }
  0x24   : > { %s445_s23 = scalar_lea.vmem %s444_s22, 2048  ;;  %p446_p9 = scmp.lt.s32.totalorder %s625_s29, %s444_s22 }
  0x25   : > { %p441_p5 = pnand %p439_p2, %p425_p3  ;;  %p447_p4 = scmp.lt.s32.totalorder %s445_s23, %s438_s16 }
  0x27   : > { %p442_p11 = pneg %p441_p5  ;;  %p448_p7 = por %p447_p4, %p446_p9 }
  0x29   : > { %p449_p10 = pnand %p448_p7, %p442_p11 }
  0x2b   : > { %452 = shalt.err (!%p449_p10)
}
  0x2c   : > { %s538_s24 = smov 128   ;;  %s539_s25 = smov 8  }
  0x2d   : > { %363 = dma.hbm_to_vmem [thread:$0]  (!%p629_p0), %s623_s27, 1024, %s625_s29, %s634_s2, %s538_s24, %s538_s24, %s539_s25  }
  0x2e   : > { %p124_p12 = scmp.lt.s32.totalorder %s535_s11, 3  ;;  %p773_p1 = scmp.ge.s32.totalorder %s535_s11, 1 }
  0x30   : > { %p125_p3 = pnand %p773_p1, %p124_p12 }
  0x31   : > { %s666_s26 = sand.u32 (!%p125_p3), 1, %s519_s7  }
  0x32   : > { %128 = sbr.rel (%p125_p3) target bundleno = 202 (0xca), region = 24  ;;  %s335_s28 = sshll.u32 (!%p125_p3), %s666_s26, 6 }
  0x33   : > { %s131_s3 = scalar_lea.sflag (!%p125_p3), [#allocation3], %s666_s26  ;;  %s134_s4 = scalar_lea.vmem (!%p125_p3), [#allocation2], %s335_s28 }
  0x39   : > { %506 = dma.done.wait (%p601_p8), %s131_s3, 1024  }
  0x3a   : > { %508 = vsyncadd (%p601_p8), %s131_s3, 4294966272  ;;  %s336_s27 = sshll.u32 %s666_s26, 7  ;;  %v166_v0 = vld [vmem:[%s134_s4 + $0x20] sm:$0xff]  ;;  %v167_v2 = vld [vmem:[%s134_s4 + $0x30] sm:$0xff]  ;;  %vm159_vm0 = vcmask 64512   ;;  %s540_s29 = smov 120  }
  0x3b   : > { %v164_v1 = vld [vmem:[%s134_s4] sm:$0xff]  ;;  %176 = vrot.lane.b32.xlu1 %v166_v0, %s540_s29  ;;  %v165_v3 = vld [vmem:[%s134_s4 + $0x10] sm:$0xff]  ;;  %v199_v4 = vld [vmem:[%s134_s4 + $0x18] sm:$0xff]  ;;  %s675_s30 = scalar_lea.vmem [#allocation5], %s336_s27  ;;  %s355_s18 = sshll.u32 %s527_s9, 11 }
  0x3c   : > { %172 = vrot.lane.b32.xlu0 %v164_v1, %s540_s29  ;;  %160 = vst.msk [vmem:[%s675_s30] sm:$0xff] %vm159_vm0, %v164_v1  ;;  %162 = vst.msk [vmem:[%s675_s30 + $0x10] sm:$0xff] %vm159_vm0, %v166_v0  ;;  %v198_v5 = vld [vmem:[%s134_s4 + $0x8] sm:$0xff]  ;;  %s240_s2 = sshll.u32 %s675_s30, 4  ;;  %s710_s13 = scalar_lea.hbm %s766_s1, %s355_s18  ;;  %s712_s2 = int_to_ptr.vmem [resolvable:$true] %s240_s2 }
  0x3d   : > { %163 = vst.msk [vmem:[%s675_s30 + $0x18] sm:$0xff] %vm159_vm0, %v167_v2  ;;  %v201_v6 = vld [vmem:[%s134_s4 + $0x38] sm:$0xff]  ;;  %v200_v7 = vld [vmem:[%s134_s4 + $0x28] sm:$0xff]  ;;  %161 = vst.msk [vmem:[%s675_s30 + $0x8] sm:$0xff] %vm159_vm0, %v165_v3  ;;  %s224_s9 = scalar_lea.sflag [#allocation4], %s666_s26  ;;  %s453_s15 = scalar_lea.vmem %s712_s2, 2048 }
  0x3e   : > { %342 = vst.msk [vmem:[%s675_s30 + $0x48] sm:$0xff] %vm159_vm0, %v199_v4  ;;  %341 = vst.msk [vmem:[%s675_s30 + $0x40] sm:$0xff] %vm159_vm0, %v198_v5  ;;  %p454_p8 = scmp.ne.s32.totalorder %s712_s2, %s453_s15  ;;  %p774_p9 = scmp.ne.s32.totalorder %s770_s19, 0 }
  0x3f   : > { %343 = vst.msk [vmem:[%s675_s30 + $0x50] sm:$0xff] %vm159_vm0, %v200_v7  ;;  %344 = vst.msk [vmem:[%s675_s30 + $0x58] sm:$0xff] %vm159_vm0, %v201_v6  ;;  %178 = vrot.lane.b32.xlu1 %v167_v2, %s540_s29  ;;  %s541_s16 = smov [#allocation5]  }
  0x40   : > { %174 = vrot.lane.b32.xlu0 %v165_v3, %s540_s29  ;;  %p455_p11 = pnand %p454_p8, %p774_p9  ;;  %s457_s17 = sshll.u32 %s541_s16, 4  ;;  %s458_s17 = int_to_ptr.vmem [resolvable:$false] %s457_s17 }
  0x41   : > { %s459_s22 = scalar_lea.vmem %s458_s17, 4096  ;;  %p460_p6 = scmp.lt.s32.totalorder %s712_s2, %s458_s17 }
  0x42   : > { %p456_p0 = pneg %p455_p11  ;;  %p461_p13 = scmp.lt.s32.totalorder %s459_s22, %s453_s15 }
  0x43   : > { %208 = vrot.lane.b32.xlu1 %v199_v4, %s540_s29 }
  0x44   : > { %206 = vrot.lane.b32.xlu0 %v198_v5, %s540_s29  ;;  %p462_p2 = por %p461_p13, %p460_p6 }
  0x46   : > { %p463_p5 = pnand %p462_p2, %p456_p0 }
  0x47   : > { %212 = vrot.lane.b32.xlu1 %v201_v6, %s540_s29 }
  0x48   : > { %210 = vrot.lane.b32.xlu0 %v200_v7, %s540_s29 }
  0xad   : > { %v177_v8 = vpop.permute.xlu1 %176 }
  0xae   : > { %v173_v9 = vpop.permute.xlu0 %172  ;;  %339 = vst.msk [vmem:[%s675_s30 + $0x30] sm:$0xff] %vm159_vm0, %v177_v8 }
  0xaf   : > { %337 = vst.msk [vmem:[%s675_s30 + $0x20] sm:$0xff] %vm159_vm0, %v173_v9 }
  0xb1   : > { %v179_v10 = vpop.permute.xlu1 %178 }
  0xb2   : > { %v175_v11 = vpop.permute.xlu0 %174  ;;  %340 = vst.msk [vmem:[%s675_s30 + $0x38] sm:$0xff] %vm159_vm0, %v179_v10 }
  0xb3   : > { %338 = vst.msk [vmem:[%s675_s30 + $0x28] sm:$0xff] %vm159_vm0, %v175_v11 }
  0xb5   : > { %v209_v12 = vpop.permute.xlu1 %208 }
  0xb6   : > { %v207_v13 = vpop.permute.xlu0 %206  ;;  %346 = vst.msk [vmem:[%s675_s30 + $0x68] sm:$0xff] %vm159_vm0, %v209_v12 }
  0xb7   : > { %345 = vst.msk [vmem:[%s675_s30 + $0x60] sm:$0xff] %vm159_vm0, %v207_v13 }
  0xb9   : > { %v213_v14 = vpop.permute.xlu1 %212 }
  0xba   : > { %v211_v15 = vpop.permute.xlu0 %210  ;;  %348 = vst.msk [vmem:[%s675_s30 + $0x78] sm:$0xff] %vm159_vm0, %v213_v14 }
  0xbb   : > { %347 = vst.msk [vmem:[%s675_s30 + $0x70] sm:$0xff] %vm159_vm0, %v211_v15 }
  0xbc   : > { %466 = shalt.err (!%p463_p5)
}
  0xbd   : > { %s467_s23 = scalar_lea.hbm %s710_s13, 2048  ;;  %s471_s28 = scalar_lea.hbm %s766_s1, 4096 }
  0xbe   : > { %p468_p4 = scmp.ne.s32.totalorder %s710_s13, %s467_s23  ;;  %p472_p12 = scmp.lt.u32.totalorder %s710_s13, %s766_s1 }
  0xbf   : > { %p473_p1 = scmp.lt.u32.totalorder %s471_s28, %s467_s23  ;;  %p475_p8 = scmp.lt.u32.totalorder %s467_s23, %s710_s13 }
  0xc0   : > { %p469_p7 = pnand %p468_p4, %p774_p9 }
  0xc1   : > { %p474_p3 = por %p473_p1, %p472_p12 }
  0xc2   : > { %p470_p10 = pneg %p469_p7 }
  0xc3   : > { %p476_p11 = por %p475_p8, %p474_p3 }
  0xc5   : > { %p477_p0 = pnand %p476_p11, %p470_p10 }
  0xc7   : > { %480 = shalt.err (!%p477_p0)
}
  0xc8   : > { %s542_s27 = smov 128   ;;  %s543_s29 = smov 8  }
  0xc9   : > { %358 = dma.vmem_to_hbm [thread:$0]  (%p774_p9), %s712_s2, 2048, %s710_s13, %s224_s9, %s542_s27, %s542_s27, %s543_s29  }
  0xca PF: > { %s255_s30 = sand.u32 1, %s515_s6   ;;  %p775_p6 = scmp.ne.s32.totalorder %s771_s21, 0 }
  0xcb   : > { %p776_p13 = scmp.ge.s32.totalorder %s535_s11, 2  ;;  %s256_s18 = scalar_lea.sflag [#allocation4], %s255_s30 }
  0xcd   : > { %p365_p2 = pnand %p776_p13, %p775_p6 }
  0xcf   : > { %510 = dma.done.wait (!%p365_p2), %s256_s18, 2048  }
  0xd0   : > { %512 = vsyncadd (!%p365_p2), %s256_s18, 4294965248  ;;  %s17_s11 = sadd.s32 1, %s535_s11   ;;  %s777_s6 = smov %s519_s7 }
  0xd1   : > { %p14_p5 = scmp.ge.s32.totalorder %s17_s11, 4   ;;  %s778_s7 = smov %s523_s8 }
  0xd2   : > { %s779_s8 = smov %s610_s20  ;;  %s780_s9 = smov %s531_s10 }
  0xd3   : > { %s781_s10 = smov %s783_s14  ;;  %16 = sbr.rel (!%p14_p5) target bundleno = 6 (0x6), region = 72 }
  0xda   :  { %261 = vsyncpa [#allocation3], 1 }
  0xdb   :  { %263 = vsyncpa [#allocation3 + $0x1], 1 }
  0xdc   :  { %264 = vsyncpa [#allocation4], 1 }
  0xdd   :  { %266 = vsyncpa [#allocation4 + $0x1], 1 }

</bundles_post_ra>
